<compile_context>
chip_gen: v6e
topology: v6e:2x2x1
jax: 0.10.0
libtpu: 0.0.40
codegen_flags: <defaults>
</compile_context>

<pallas_src>
import functools

import jax
import jax.numpy as jnp
from jax.experimental import pallas as pl
from jax.experimental.pallas import tpu as pltpu

_EPS = 1e-5  # CLIP/open_clip LayerNorm eps.  TODO(synk): timm default is 1e-6.


def _round_up(x, m):
    return (x + m - 1) // m * m


# ---------------- per-generation compiler params ----------------
def _vmem_limit_bytes():
    cap = 64 * 1024 * 1024
    try:
        info = pltpu.get_tpu_info()
        cap = int(getattr(info, "vmem_capacity_bytes", cap) or cap)
    except Exception:
        pass
    # leave headroom for compiler scratch; cap at 100 MiB on 128 MiB parts.
    return max(32 * 1024 * 1024, min(cap - 16 * 1024 * 1024, 100 * 1024 * 1024))


_CPARAMS = pltpu.CompilerParams(
    dimension_semantics=("parallel",),
    vmem_limit_bytes=_vmem_limit_bytes(),
)

# ---------------- single-buffered specs for grid-invariant operands ----------------
try:
    _BUF1 = pl.Buffered(1)
except Exception:  # very old jax without pipeline_mode support
    _BUF1 = None


def _const_spec(shape):
    """BlockSpec for an operand whose block never changes across the grid."""
    index_map = lambda n: (0,) * len(shape)
    if _BUF1 is not None:
        try:
            return pl.BlockSpec(shape, index_map, pipeline_mode=_BUF1)
        except TypeError:
            pass
    return pl.BlockSpec(shape, index_map)


def _layernorm(x, gamma, beta):
    mu = jnp.mean(x, axis=-1, keepdims=True)
    xc = x - mu
    var = jnp.mean(xc * xc, axis=-1, keepdims=True)
    return xc * jax.lax.rsqrt(var + _EPS) * gamma + beta


# ---------------- fused patch-embed + cls + pos + norm_pre ----------------
def _embed_kernel(seq_len, p_ref, w_ref, pb_ref, cls_ref, pos_ref,
                  g_ref, b_ref, o_ref):
    S_pad, D = o_ref.shape[1], o_ref.shape[2]
    tok = (jnp.dot(p_ref[0].astype(w_ref.dtype), w_ref[...],
                   preferred_element_type=jnp.float32) + pb_ref[...])      # (L, D)
    seq = jnp.concatenate([cls_ref[...], tok], axis=0) + pos_ref[...]      # (S, D)
    seq = _layernorm(seq, g_ref[...], b_ref[...])
    if S_pad > seq_len:                                                    # zero pad rows
        seq = jnp.concatenate(
            [seq, jnp.zeros((S_pad - seq_len, D), jnp.float32)], axis=0)
    o_ref[0] = seq.astype(o_ref.dtype)


def embed(x, params):
    N, C, H, W = x.shape
    ph, pw = params['patch_size']
    gh, gw = H // ph, W // pw
    L = gh * gw
    S = L + 1
    S_pad = _round_up(S, 8)
    k_pad, D = params['patch_w'].shape

    # im2col for non-overlapping patches; flatten order (C, ph, pw) matches
    # the PyTorch Conv2d weight layout (D, C, ph, pw).
    xp = x.reshape(N, C, gh, ph, gw, pw)
    xp = jnp.transpose(xp, (0, 2, 4, 1, 3, 5)).reshape(N, L, C * ph * pw)
    xp = jnp.pad(xp, ((0, 0), (0, 0), (0, k_pad - C * ph * pw)))
    xp = xp.astype(params['patch_w'].dtype)

    out = pl.pallas_call(
        functools.partial(_embed_kernel, S),
        grid=(N,),
        out_shape=jax.ShapeDtypeStruct((N, S_pad, D), jnp.float32),
        in_specs=[
            pl.BlockSpec((1, L, k_pad), lambda n: (n, 0, 0)),
            _const_spec((k_pad, D)),
            _const_spec((1, D)),
            _const_spec((1, D)),
            _const_spec((S, D)),
            _const_spec((1, D)),
            _const_spec((1, D)),
        ],
        out_specs=pl.BlockSpec((1, S_pad, D), lambda n: (n, 0, 0)),
        compiler_params=_CPARAMS,
    )(xp, params['patch_w'], params['patch_b'], params['cls'],
      params['pos'], params['pre_g'], params['pre_b'])
    return out, (gh, gw), S


# ---------------- fused transformer resblock (attention + MLP) ----------------
def _resblock_kernel(num_heads, seq_len,
                     x_ref, g1_ref, b1_ref, wqkv_ref, bqkv_ref, wo_ref, bo_ref,
                     g2_ref, b2_ref, w1_ref, bm1_ref, w2_ref, bm2_ref,
                     o_ref, ctx_scr):
    S_pad, D = x_ref.shape[1], x_ref.shape[2]
    dh = D // num_heads
    scale = dh ** -0.5

    x = x_ref[0].astype(jnp.float32)                                # (S_pad, D)
    xln = _layernorm(x, g1_ref[...], b1_ref[...])

    # Fused QKV: one full-width MXU matmul (bf16 operands, f32 accumulate).
    qkv = (jnp.dot(xln.astype(wqkv_ref.dtype), wqkv_ref[...],
                   preferred_element_type=jnp.float32) + bqkv_ref[...])  # (S_pad, 3D)

    if S_pad > seq_len:  # mask padded key columns before softmax
        col = jax.lax.broadcasted_iota(jnp.int32, (S_pad, S_pad), 1)
        mask_bias = jnp.where(col < seq_len, 0.0, -1e30).astype(jnp.float32)
    else:
        mask_bias = None

    # Static per-head unroll; each head's (S, dh) context is stored into its
    # lane slice of a VMEM scratch (bounds live ranges; no concat spills).
    for h in range(num_heads):
        q = (qkv[:, h * dh:(h + 1) * dh] * scale).astype(jnp.bfloat16)
        k = qkv[:, D + h * dh:D + (h + 1) * dh].astype(jnp.bfloat16)
        v = qkv[:, 2 * D + h * dh:2 * D + (h + 1) * dh].astype(jnp.bfloat16)
        s = jax.lax.dot_general(q, k, (((1,), (1,)), ((), ())),
                                preferred_element_type=jnp.float32)      # (S_pad, S_pad)
        if mask_bias is not None:
            s = s + mask_bias
        s = s - jnp.max(s, axis=-1, keepdims=True)
        p = jnp.exp(s)
        p = p / jnp.sum(p, axis=-1, keepdims=True)                       # exact softmax
        ctx_scr[:, h * dh:(h + 1) * dh] = jnp.dot(
            p.astype(jnp.bfloat16), v, preferred_element_type=jnp.float32)

    attn = (jnp.dot(ctx_scr[...].astype(wo_ref.dtype), wo_ref[...],
                    preferred_element_type=jnp.float32) + bo_ref[...])
    xr = x + attn

    # MLP half (fused -> no HBM round trip of the residual stream)
    x2 = _layernorm(xr, g2_ref[...], b2_ref[...])
    h1 = (jnp.dot(x2.astype(w1_ref.dtype), w1_ref[...],
                  preferred_element_type=jnp.float32) + bm1_ref[...])
    # TODO(synk): timm/CLIP uses exact (erf) GELU; tanh approximation used here.
    h1 = jax.nn.gelu(h1, approximate=True)
    h2 = (jnp.dot(h1.astype(w2_ref.dtype), w2_ref[...],
                  preferred_element_type=jnp.float32) + bm2_ref[...])
    o_ref[0] = (xr + h2).astype(o_ref.dtype)


def vit_block(x, blk, num_heads, seq_len):
    N, S_pad, D = x.shape
    mlp_dim = blk['w1'].shape[1]
    return pl.pallas_call(
        functools.partial(_resblock_kernel, num_heads, seq_len),
        grid=(N,),
        out_shape=jax.ShapeDtypeStruct((N, S_pad, D), jnp.float32),
        in_specs=[
            pl.BlockSpec((1, S_pad, D), lambda n: (n, 0, 0)),
            _const_spec((1, D)), _const_spec((1, D)),
            _const_spec((D, 3 * D)), _const_spec((1, 3 * D)),
            _const_spec((D, D)), _const_spec((1, D)),
            _const_spec((1, D)), _const_spec((1, D)),
            _const_spec((D, mlp_dim)), _const_spec((1, mlp_dim)),
            _const_spec((mlp_dim, D)), _const_spec((1, D)),
        ],
        out_specs=pl.BlockSpec((1, S_pad, D), lambda n: (n, 0, 0)),
        scratch_shapes=[pltpu.VMEM((S_pad, D), jnp.float32)],
        compiler_params=_CPARAMS,
    )(x, blk['ln1_g'], blk['ln1_b'], blk['wqkv'], blk['bqkv'],
      blk['wo'], blk['bo'], blk['ln2_g'], blk['ln2_b'],
      blk['w1'], blk['b1'], blk['w2'], blk['b2'])


# ---------------- parameter init (deterministic, synthetic) ----------------
def init_params(key, *, in_chans, patch, embed_dim, num_heads, mlp_dim, depth, grid):
    gh, gw = grid
    n_tok = gh * gw + 1
    k = in_chans * patch[0] * patch[1]
    k_pad = _round_up(k, 128)
    keys = jax.random.split(key, 4 + depth)

    def nrm(kk, shape):
        return 0.02 * jax.random.normal(kk, shape, dtype=jnp.float32)

    patch_w = jnp.pad(nrm(keys[0], (k, embed_dim)), ((0, k_pad - k), (0, 0)))
    params = dict(
        patch_size=patch,
        heads=num_heads,
        patch_w=patch_w.astype(jnp.bfloat16),   # bf16 weights: MXU-native, half VMEM
        patch_b=jnp.zeros((1, embed_dim), jnp.float32),
        cls=nrm(keys[1], (1, embed_dim)),
        pos=nrm(keys[2], (n_tok, embed_dim)),
        pre_g=jnp.ones((1, embed_dim), jnp.float32),
        pre_b=jnp.zeros((1, embed_dim), jnp.float32),
        blocks=[],
    )
    for d in range(depth):
        bkeys = jax.random.split(keys[4 + d], 4)
        params['blocks'].append(dict(
            ln1_g=jnp.ones((1, embed_dim), jnp.float32),
            ln1_b=jnp.zeros((1, embed_dim), jnp.float32),
            wqkv=nrm(bkeys[0], (embed_dim, 3 * embed_dim)).astype(jnp.bfloat16),
            bqkv=jnp.zeros((1, 3 * embed_dim), jnp.float32),
            wo=nrm(bkeys[1], (embed_dim, embed_dim)).astype(jnp.bfloat16),
            bo=jnp.zeros((1, embed_dim), jnp.float32),
            ln2_g=jnp.ones((1, embed_dim), jnp.float32),
            ln2_b=jnp.zeros((1, embed_dim), jnp.float32),
            w1=nrm(bkeys[2], (embed_dim, mlp_dim)).astype(jnp.bfloat16),
            b1=jnp.zeros((1, mlp_dim), jnp.float32),
            w2=nrm(bkeys[3], (mlp_dim, embed_dim)).astype(jnp.bfloat16),
            b2=jnp.zeros((1, embed_dim), jnp.float32),
        ))
    return params


# ---------------- FeatureExtractor.forward ----------------
def feature_extractor_forward(x_img, params):
    x, (gh, gw), S = embed(x_img, params)
    L = gh * gw
    # String keys keep the result a valid JAX pytree (mixed int/str keys don't sort).
    outputs = {}

    def save(idx, feat):  # mirrors ClipOutput.save: 'n (h w) c -> n c h w' + cls slice
        n, _, c = feat.shape
        spatial = feat[:, 1:1 + L, :]
        outputs[str(idx)] = spatial.reshape(n, gh, gw, c).transpose(0, 3, 1, 2)
        outputs[f'{idx}_cls_token'] = feat[:, 0:1, :]

    save(0, x)
    for i, blk in enumerate(params['blocks'], start=1):
        x = vit_block(x, blk, params['heads'], S)
        save(i, x)
    return outputs


if __name__ == "__main__":
    key = jax.random.PRNGKey(0)
    k_img, k_par = jax.random.split(key)

    # small, module-consistent shapes
    N, Cin, H, W = 2, 3, 16, 16
    patch = (8, 8)
    embed_dim, num_heads, mlp_dim, depth = 32, 4, 128, 2
    grid = (H // patch[0], W // patch[1])

    x = jax.random.normal(k_img, (N, Cin, H, W), dtype=jnp.float32)
    params = init_params(k_par, in_chans=Cin, patch=patch, embed_dim=embed_dim,
                         num_heads=num_heads, mlp_dim=mlp_dim, depth=depth,
                         grid=grid)

    outputs = feature_extractor_forward(x, params)
    jax.block_until_ready(outputs)

    # sanity on shapes (no prints besides KERNEL_OK)
    assert outputs["0"].shape == (N, embed_dim, grid[0], grid[1])
    assert outputs["0_cls_token"].shape == (N, 1, embed_dim)
    assert outputs[str(depth)].shape == (N, embed_dim, grid[0], grid[1])
    for v in outputs.values():
        assert bool(jnp.all(jnp.isfinite(v)))

    print("KERNEL_OK")
</pallas_src>

<mosaic_0001>
module attributes {stable_mosaic.version = 11 : i64} {
  func.func @_embed_kernel(%arg0: i32, %arg1: memref<1x4x256xbf16, #tpu.memory_space<vmem>>, %arg2: memref<256x32xbf16, #tpu.memory_space<vmem>>, %arg3: memref<1x32xf32, #tpu.memory_space<vmem>>, %arg4: memref<1x32xf32, #tpu.memory_space<vmem>>, %arg5: memref<5x32xf32, #tpu.memory_space<vmem>>, %arg6: memref<1x32xf32, #tpu.memory_space<vmem>>, %arg7: memref<1x32xf32, #tpu.memory_space<vmem>>, %arg8: memref<1x8x32xf32, #tpu.memory_space<vmem>>) attributes {dimension_semantics = [#tpu.dimension_semantics<parallel>], iteration_bounds = array<i64: 2>, scalar_prefetch = 0 : i64, scratch_operands = 0 : i64, tpu.core_type = #tpu.core_type<tc>, window_params = [{transform_indices = @transform_0, window_bounds = array<i64: 1, 4, 256>}, {pipeline_mode = #tpu.pipeline_mode<synchronous>, transform_indices = @transform_1, window_bounds = array<i64: 256, 32>}, {pipeline_mode = #tpu.pipeline_mode<synchronous>, transform_indices = @transform_2, window_bounds = array<i64: 1, 32>}, {pipeline_mode = #tpu.pipeline_mode<synchronous>, transform_indices = @transform_3, window_bounds = array<i64: 1, 32>}, {pipeline_mode = #tpu.pipeline_mode<synchronous>, transform_indices = @transform_4, window_bounds = array<i64: 5, 32>}, {pipeline_mode = #tpu.pipeline_mode<synchronous>, transform_indices = @transform_5, window_bounds = array<i64: 1, 32>}, {pipeline_mode = #tpu.pipeline_mode<synchronous>, transform_indices = @transform_6, window_bounds = array<i64: 1, 32>}, {transform_indices = @transform_7, window_bounds = array<i64: 1, 8, 32>}]} {
    %c0 = arith.constant 0 : index
    %c0_0 = arith.constant 0 : index
    %c0_1 = arith.constant 0 : index
    %0 = vector.load %arg1[%c0, %c0_0, %c0_1] : memref<1x4x256xbf16, #tpu.memory_space<vmem>>, vector<1x4x256xbf16>
    %1 = vector.shape_cast %0 : vector<1x4x256xbf16> to vector<4x256xbf16>
    %c0_2 = arith.constant 0 : index
    %c0_3 = arith.constant 0 : index
    %2 = vector.load %arg2[%c0_2, %c0_3] : memref<256x32xbf16, #tpu.memory_space<vmem>>, vector<256x32xbf16>
    %cst = arith.constant dense<0.000000e+00> : vector<4x32xf32>
    %3 = tpu.matmul %1, %2, %cst {dimension_numbers = #tpu.dot_dimension_numbers<[1], [0], [0], [1], [0, 0, 1, 1], [], []>} : vector<4x256xbf16>, vector<256x32xbf16>, vector<4x32xf32> -> vector<4x32xf32>
    %c0_4 = arith.constant 0 : index
    %c0_5 = arith.constant 0 : index
    %4 = vector.load %arg3[%c0_4, %c0_5] : memref<1x32xf32, #tpu.memory_space<vmem>>, vector<1x32xf32>
    %5 = vector.broadcast %4 : vector<1x32xf32> to vector<4x32xf32>
    %6 = arith.addf %3, %5 : vector<4x32xf32>
    %c0_6 = arith.constant 0 : index
    %c0_7 = arith.constant 0 : index
    %7 = vector.load %arg4[%c0_6, %c0_7] : memref<1x32xf32, #tpu.memory_space<vmem>>, vector<1x32xf32>
    %8 = tpu.concatenate %7, %6 in 0 : vector<1x32xf32>, vector<4x32xf32> -> vector<5x32xf32>
    %c0_8 = arith.constant 0 : index
    %c0_9 = arith.constant 0 : index
    %9 = vector.load %arg5[%c0_8, %c0_9] : memref<5x32xf32, #tpu.memory_space<vmem>>, vector<5x32xf32>
    %10 = arith.addf %8, %9 : vector<5x32xf32>
    %c0_10 = arith.constant 0 : index
    %c0_11 = arith.constant 0 : index
    %11 = vector.load %arg6[%c0_10, %c0_11] : memref<1x32xf32, #tpu.memory_space<vmem>>, vector<1x32xf32>
    %c0_12 = arith.constant 0 : index
    %c0_13 = arith.constant 0 : index
    %12 = vector.load %arg7[%c0_12, %c0_13] : memref<1x32xf32, #tpu.memory_space<vmem>>, vector<1x32xf32>
    %cst_14 = arith.constant dense<0.000000e+00> : vector<5xf32>
    %13 = vector.multi_reduction <add>, %10, %cst_14 [1] : vector<5x32xf32> to vector<5xf32>
    %14 = vector.shape_cast %13 : vector<5xf32> to vector<5x1xf32>
    %cst_15 = arith.constant 3.200000e+01 : f32
    %15 = vector.broadcast %cst_15 : f32 to vector<5x1xf32>
    %16 = arith.divf %14, %15 : vector<5x1xf32>
    %17 = vector.broadcast %16 : vector<5x1xf32> to vector<5x32xf32>
    %18 = arith.subf %10, %17 : vector<5x32xf32>
    %19 = arith.mulf %18, %18 : vector<5x32xf32>
    %cst_16 = arith.constant dense<0.000000e+00> : vector<5xf32>
    %20 = vector.multi_reduction <add>, %19, %cst_16 [1] : vector<5x32xf32> to vector<5xf32>
    %21 = vector.shape_cast %20 : vector<5xf32> to vector<5x1xf32>
    %cst_17 = arith.constant 3.200000e+01 : f32
    %22 = vector.broadcast %cst_17 : f32 to vector<5x1xf32>
    %23 = arith.divf %21, %22 : vector<5x1xf32>
    %cst_18 = arith.constant 9.99999974E-6 : f32
    %24 = vector.broadcast %cst_18 : f32 to vector<5x1xf32>
    %25 = arith.addf %23, %24 : vector<5x1xf32>
    %26 = math.rsqrt %25 : vector<5x1xf32>
    %27 = vector.broadcast %26 : vector<5x1xf32> to vector<5x32xf32>
    %28 = arith.mulf %18, %27 : vector<5x32xf32>
    %29 = vector.broadcast %11 : vector<1x32xf32> to vector<5x32xf32>
    %30 = arith.mulf %28, %29 : vector<5x32xf32>
    %31 = vector.broadcast %12 : vector<1x32xf32> to vector<5x32xf32>
    %32 = arith.addf %30, %31 : vector<5x32xf32>
    %cst_19 = arith.constant 0.000000e+00 : f32
    %33 = vector.broadcast %cst_19 : f32 to vector<3x32xf32>
    %34 = tpu.concatenate %32, %33 in 0 : vector<5x32xf32>, vector<3x32xf32> -> vector<8x32xf32>
    %c0_20 = arith.constant 0 : index
    %c0_21 = arith.constant 0 : index
    %c0_22 = arith.constant 0 : index
    %35 = vector.load %arg8[%c0_20, %c0_21, %c0_22] : memref<1x8x32xf32, #tpu.memory_space<vmem>>, vector<1x8x32xf32>
    %36 = vector.shape_cast %35 : vector<1x8x32xf32> to vector<8x32xf32>
    %37 = vector.shape_cast %34 : vector<8x32xf32> to vector<1x8x32xf32>
    tpu.vector_store %arg8[%c0_20, %c0_21, %c0_22], %37 {strides = array<i32>} : memref<1x8x32xf32, #tpu.memory_space<vmem>>, vector<1x8x32xf32>,
    return
  }
  func.func @transform_0(%arg0: i32) -> (i32, i32, i32) {
    %c0_i32 = arith.constant 0 : i32
    %c0_i32_0 = arith.constant 0 : i32
    %c0_i32_1 = arith.constant 0 : i32
    return %arg0, %c0_i32, %c0_i32_0 : i32, i32, i32
  }
  func.func @transform_1(%arg0: i32) -> (i32, i32) {
    %c0_i32 = arith.constant 0 : i32
    %c0_i32_0 = arith.constant 0 : i32
    %c0_i32_1 = arith.constant 0 : i32
    return %c0_i32, %c0_i32_0 : i32, i32
  }
  func.func @transform_2(%arg0: i32) -> (i32, i32) {
    %c0_i32 = arith.constant 0 : i32
    %c0_i32_0 = arith.constant 0 : i32
    %c0_i32_1 = arith.constant 0 : i32
    return %c0_i32, %c0_i32_0 : i32, i32
  }
  func.func @transform_3(%arg0: i32) -> (i32, i32) {
    %c0_i32 = arith.constant 0 : i32
    %c0_i32_0 = arith.constant 0 : i32
    %c0_i32_1 = arith.constant 0 : i32
    return %c0_i32, %c0_i32_0 : i32, i32
  }
  func.func @transform_4(%arg0: i32) -> (i32, i32) {
    %c0_i32 = arith.constant 0 : i32
    %c0_i32_0 = arith.constant 0 : i32
    %c0_i32_1 = arith.constant 0 : i32
    return %c0_i32, %c0_i32_0 : i32, i32
  }
  func.func @transform_5(%arg0: i32) -> (i32, i32) {
    %c0_i32 = arith.constant 0 : i32
    %c0_i32_0 = arith.constant 0 : i32
    %c0_i32_1 = arith.constant 0 : i32
    return %c0_i32, %c0_i32_0 : i32, i32
  }
  func.func @transform_6(%arg0: i32) -> (i32, i32) {
    %c0_i32 = arith.constant 0 : i32
    %c0_i32_0 = arith.constant 0 : i32
    %c0_i32_1 = arith.constant 0 : i32
    return %c0_i32, %c0_i32_0 : i32, i32
  }
  func.func @transform_7(%arg0: i32) -> (i32, i32, i32) {
    %c0_i32 = arith.constant 0 : i32
    %c0_i32_0 = arith.constant 0 : i32
    %c0_i32_1 = arith.constant 0 : i32
    return %arg0, %c0_i32, %c0_i32_0 : i32, i32, i32
  }
}

</mosaic_0001>

<bundles_post_ra>
// kernel: tpu_custom_call.1
= control target key start
LH: loop header
LB: loop body
LE: loop exit
PB: predicated region body
PF: predicated region fallthrough
CT: control target
= control target key end

     0   :  { %12 = vsyncpa [#allocation3], 0  ;;  %s951_s0 = inlined_call_operand.vmem [shape: bf16[2,4,256], index: 0, kind: input, shape index: {}]   ;;  %s952_s1 = inlined_call_operand.vmem [shape: bf16[256,32], index: 1, kind: input, shape index: {}]   ;;  %s953_s2 = inlined_call_operand.vmem [shape: f32[1,32], index: 2, kind: input, shape index: {}]   ;;  %s954_s3 = inlined_call_operand.vmem [shape: f32[1,32], index: 3, kind: input, shape index: {}]   ;;  %s955_s4 = inlined_call_operand.vmem [shape: f32[5,32], index: 4, kind: input, shape index: {}]   ;;  %s956_s5 = inlined_call_operand.vmem [shape: f32[1,32], index: 5, kind: input, shape index: {}]   ;;  %s957_s6 = inlined_call_operand.vmem [shape: f32[1,32], index: 6, kind: input, shape index: {}]   ;;  %s958_s7 = inlined_call_operand.hbm [shape: f32[2,8,32], index: 7, kind: output, shape index: {}]  }
   0x1   :  { %14 = vsyncpa [#allocation3 + $0x1], 0  ;;  %s795_s24 = smov 0   ;;  %s797_s25 = smov 0  }
   0x2   :  { %s799_s26 = smov 0   ;;  %s801_s27 = smov 0  }
   0x3 LB: > { %s816_s28 = sadd.s32 4294967295, %s752_s27   ;;  %s581_s29 = sadd.s32 4294967294, %s752_s27   ;;  %s752_s27 = sphi %s801_s27, %s964_s27   ;;  %s748_s26 = sphi %s799_s26, %s963_s26   ;;  %s744_s25 = sphi %s797_s25, %s962_s25   ;;  %s740_s24 = sphi %s795_s24, %s961_s24  }
   0x4   : > { %s820_s30 = sadd.s32 1, %s752_s27   ;;  %s179_s8 = sadd.s32 1, %s748_s26 }
   0x5   : > { %s176_s9 = ssub.s32 %s752_s27, %s820_s30  ;;  %p189_p0 = scmp.ne.s32.totalorder %s748_s26, %s744_s25 }
   0x6   : > { %p177_p1 = scmp.eq.s32.totalorder %s176_s9, 0  ;;  %p190_p2 = scmp.eq.s32.totalorder %s816_s28, 1 }
   0x7   : > { %p195_p3 = scmp.ne.s32.totalorder %s744_s25, %s740_s24  ;;  %p196_p4 = scmp.eq.s32.totalorder %s581_s29, 1 }
   0x8   : > { %s831_s10 = scalar_select %p177_p1, %s748_s26, %s179_s8  }
   0x9   : > { %p833_p5 = por %p190_p2, %p189_p0  ;;  %p837_p6 = por %p196_p4, %p195_p3 }
   0xa   : > { %p584_p7 = scmp.ge.s32.totalorder %s752_s27, 1  ;;  %p240_p8 = scmp.lt.s32.totalorder %s752_s27, 3 }
   0xc   : > { %p241_p9 = pnand %p584_p7, %p240_p8 }
   0xd   : > { %p272_p10 = scmp.lt.s32.totalorder (!%p241_p9), %s816_s28, 1  ;;  %s609_s20 = sshll.u32 (!%p241_p9), %s816_s28, 7 }
   0xe   : > { %244 = sbr.rel (%p241_p9) target bundleno = 578 (0x242), region = 48  ;;  %s916_s8 = scalar_lea.hbm (!%p241_p9), %s958_s7, %s609_s20 }
  0x13   : > { %v674_v0 = vld [vmem:[%s952_s1 + $0x78] sm:$0xff]   ;;  %v676_v2 = vld [vmem:[%s952_s1 + $0x70] sm:$0xff]   ;;  %v678_v4 = vld [vmem:[%s952_s1 + $0x68] sm:$0xff]   ;;  %s273_s23 = scalar_select %p272_p10, %s816_s28, 1  ;;  %vm469_vm0 = vcmask 1040384   ;;  %vm475_vm1 = vcmask 258048  }
  0x14   : > { %v675_v1 = vld [vmem:[%s952_s1 + $0x38] sm:$0xff]   ;;  %613 = vmatprep.subr.bf16.mxu0 %v674_v0  ;;  %v677_v3 = vld [vmem:[%s952_s1 + $0x30] sm:$0xff]   ;;  %v679_v5 = vld [vmem:[%s952_s1 + $0x28] sm:$0xff]   ;;  %vm504_vm2 = vcmask 1044480   ;;  %vm506_vm3 = vcmask 261120   ;;  %s754_s28 = smov [#allocation2]  }
  0x15   : > { %614 = vmatpush3.bf16.msra.mxu0 %v675_v1  ;;  %v680_v6 = vld [vmem:[%s952_s1 + $0x60] sm:$0xff]   ;;  %s612_s14 = sshll.u32 %s273_s23, 2  ;;  %v682_v8 = vld [vmem:[%s952_s1 + $0x58] sm:$0xff]   ;;  %v684_v10 = vld [vmem:[%s952_s1 + $0x50] sm:$0xff]  }
  0x16   : > { %615 = vmatprep.subr.bf16.mxu0 %v676_v2  ;;  %v681_v7 = vld [vmem:[%s952_s1 + $0x20] sm:$0xff]   ;;  %s276_s21 = scalar_lea.vmem %s951_s0, %s612_s14  ;;  %v683_v9 = vld [vmem:[%s952_s1 + $0x18] sm:$0xff]   ;;  %v685_v13 = vld [vmem:[%s952_s1 + $0x10] sm:$0xff]   ;;  %s269_s14 = sand.u32 1, %s744_s25  }
  0x17   : > { %v589_v11 = vld.sshfl [vmem:[%s276_s21] sm:$0x33 pattern:$0x76325410]  ;;  %v686_v14 = vld [vmem:[%s952_s1 + $0x48] sm:$0xff]   ;;  %s585_s15 = sshll.u32 %s269_s14, 3 }
  0x18   : > { %v326_v12 = vcombine.high %v589_v11, %v589_v11  ;;  %v687_v15 = vld [vmem:[%s952_s1 + $0x8] sm:$0xff]   ;;  %v688_v16 = vld [vmem:[%s952_s1 + $0x40] sm:$0xff]   ;;  %s271_s21 = scalar_lea.vmem [#allocation2], %s585_s15  ;;  %s509_s9 = scalar_lea.sflag [#allocation3], %s269_s14 }
  0x19   : > { %616 = vmatpush3.bf16.msra.mxu0 %v677_v3  ;;  %v689_v17 = vld [vmem:[%s952_s1] sm:$0xff]   ;;  %s522_s22 = sshll.u32 %s271_s21, 4  ;;  %s696_s15 = sshll.u32 %s754_s28, 4  ;;  %s523_s22 = int_to_ptr.vmem [resolvable:$true] %s522_s22  ;;  %s697_s15 = int_to_ptr.vmem [resolvable:$false] %s696_s15 }
  0x1a   : > { %617 = vmatprep.subr.bf16.mxu0 %v678_v4  ;;  %457 = vmatprep.mubr.bf16.mxu0 %v326_v12  ;;  %v588_v19 = vld [vmem:[%s953_s2] ss:$0 sm:$0xff]  ;;  %s692_s13 = scalar_lea.vmem %s523_s22, 128  ;;  %s698_s16 = scalar_lea.vmem %s697_s15, 256 }
  0x1b   : > { %v465_v25 = vld [vmem:[%s954_s3] sm:$0x1]  ;;  %p693_p11 = scmp.ne.s32.totalorder %s523_s22, %s692_s13  ;;  %p699_p0 = scmp.lt.s32.totalorder %s523_s22, %s697_s15 }
  0x1c   : > { %v471_v27 = vld [vmem:[%s955_s4] sm:$0x1f]  ;;  %p700_p1 = scmp.lt.s32.totalorder %s698_s16, %s692_s13 }
  0x1d   : > { %618 = vmatpush3.bf16.msra.mxu0 %v679_v5  ;;  %v606_v40 = vld [vmem:[%s956_s5] ss:$0 sm:$0xff]  ;;  %p694_p12 = pnand %p693_p11, %p833_p5 }
  0x1e   : > { %619 = vmatprep.subr.bf16.mxu0 %v680_v6  ;;  %v607_v42 = vld [vmem:[%s957_s6] ss:$0 sm:$0xff]  ;;  %p701_p2 = por %p700_p1, %p699_p0 }
  0x1f   : > { %p695_p13 = pneg %p694_p12 }
  0x21   : > { %620 = vmatpush3.bf16.msra.mxu0 %v681_v7  ;;  %p702_p3 = pnand %p701_p2, %p695_p13 }
  0x22   : > { %621 = vmatprep.subr.bf16.mxu0 %v682_v8 }
  0x25   : > { %622 = vmatpush3.bf16.msra.mxu0 %v683_v9 }
  0x26   : > { %623 = vmatprep.subr.bf16.mxu0 %v684_v10 }
  0x29   : > { %624 = vmatpush3.bf16.msra.mxu0 %v685_v13 }
  0x2a   : > { %625 = vmatprep.subr.bf16.mxu0 %v686_v14 }
  0x2d   : > { %626 = vmatpush3.bf16.msra.mxu0 %v687_v15 }
  0x2e   : > { %627 = vmatprep.subr.bf16.mxu0 %v688_v16 }
  0x31   : > { %628 = vmatpush3.bf16.msra.mxu0 %v689_v17 }
  0x34   : > { %458 = vmatmul.mubr.bf16.vlgmr.msra.gmra.mxu0 %v589_v11 }
  0xf4   : > { %v629_v18 = vpop.f32.mrf.mxu0 }
  0xf6   : > { %v630_v20 = vpop.f32.mrf.mxu0 }
  0xf7   : > { %v631_v21 = vadd.f32 %v630_v20, %v629_v18 }
  0xf8   : > { %v632_v22 = vpop.f32.mrf.mxu0 }
  0xf9   : > { %v460_v23 = vadd.f32 %v631_v21, %v588_v19 }
  0xfa   : > { %v633_v24 = vpop.f32.mrf.mxu0 }
  0xfb   : > { %v467_v26 = vrot.slane %v460_v23, 7 }
  0xfd   : > { %v470_v28 = vsel %vm469_vm0, %v465_v25, %v467_v26 }
  0xfe   : > { %v472_v29 = vadd.f32 %v471_v27, %v470_v28 }
 0x100   : > { %v476_v30 = vsel %vm475_vm1, %v472_v29, 0.0 }
 0x101   : > { %477 = vadd.xlane.f32.xlu0 %v476_v30 }
 0x18a   : > { %v478_v31 = vpop.xlane.xlu0 %477 }
 0x18b   : > { %v480_v32 = vmul.f32 0.03125, %v478_v31 }
 0x18d   : > { %v481_v33 = vsub.f32 %v472_v29, %v480_v32 }
 0x18f   : > { %v482_v34 = vmul.f32 %v481_v33, %v481_v33 }
 0x191   : > { %v483_v35 = vsel %vm475_vm1, %v482_v34, 0.0 }
 0x192   : > { %484 = vadd.xlane.f32.xlu0 %v483_v35 }
 0x21b   : > { %v485_v36 = vpop.xlane.xlu0 %484 }
 0x21c   : > { %v486_v37 = vmul.f32 0.03125, %v485_v36 }
 0x21e   : > { %v487_v38 = vadd.f32 1e-05, %v486_v37 }
 0x220   : > { %690 = vrsqrt.f32 %v487_v38 }
 0x22d   : > { %v691_v39 = vpop.eup %690 }
 0x22e   : > { %v489_v41 = vmul.f32 %v691_v39, %v481_v33 }
 0x230   : > { %v496_v43 = vmul.f32 %v606_v40, %v489_v41 }
 0x232   : > { %v503_v44 = vadd.f32 %v607_v42, %v496_v43 }
 0x234   : > { %v505_v45 = vsel %vm504_vm2, %v503_v44, 0.0 }
 0x235   : > { %507 = vst.msk [vmem:[%s271_s21] sm:$0xff] %vm506_vm3, %v505_v45 }
 0x236   : > { %705 = shalt.err (!%p702_p3)
}
 0x237   : > { %s706_s17 = scalar_lea.hbm %s916_s8, 128  ;;  %s710_s19 = scalar_lea.hbm %s958_s7, 256 }
 0x238   : > { %p707_p4 = scmp.ne.s32.totalorder %s916_s8, %s706_s17  ;;  %p711_p9 = scmp.lt.s32.totalorder %s916_s8, %s958_s7 }
 0x239   : > { %p712_p10 = scmp.lt.s32.totalorder %s710_s19, %s706_s17 }
 0x23a   : > { %p708_p7 = pnand %p707_p4, %p833_p5 }
 0x23b   : > { %p713_p11 = por %p712_p10, %p711_p9 }
 0x23c   : > { %p709_p8 = pneg %p708_p7 }
 0x23e   : > { %p714_p12 = pnand %p713_p11, %p709_p8 }
 0x240   : > { %717 = shalt.err (!%p714_p12)
}
 0x241   : > { %635 = dma.vmem_to_hbm [thread:$0]  (%p833_p5), %s523_s22, 128, %s916_s8, %s509_s9  }
 0x242 PF: > { %p641_p13 = scmp.ge.s32.totalorder %s752_s27, 2  ;;  %s534_s29 = sand.u32 1, %s740_s24  }
 0x243   : > { %s535_s23 = scalar_lea.sflag [#allocation3], %s534_s29 }
 0x244   : > { %p638_p0 = pnand %p641_p13, %p837_p6 }
 0x246   : > { %p639_p1 = pneg %p638_p0 }
 0x248   : > { %735 = dma.done.wait (%p639_p1), %s535_s23, 128  }
 0x249   : > { %737 = vsyncadd (%p639_p1), %s535_s23, 4294967168  ;;  %p17_p2 = scmp.ge.s32.totalorder %s820_s30, 4   ;;  %s961_s24 = smov %s744_s25 }
 0x24a   : > { %s962_s25 = smov %s748_s26  ;;  %s963_s26 = smov %s831_s10 }
 0x24b   : > { %s964_s27 = smov %s820_s30  ;;  %19 = sbr.rel (!%p17_p2) target bundleno = 3 (0x3), region = 83 }
 0x250   :  { %540 = vsyncpa [#allocation3], 1 }
 0x251   :  { %542 = vsyncpa [#allocation3 + $0x1], 1 }

</bundles_post_ra>
